<compile_context>
chip_gen: v5e
topology: v5e:2x2
jax: 0.10.0
libtpu: 0.0.40
codegen_flags: <defaults>
</compile_context>

<pallas_src>
import functools

import jax
import jax.numpy as jnp
from jax.experimental import pallas as pl
from jax.experimental.pallas import tpu as pltpu


def _round_up(n: int, m: int) -> int:
    return ((n + m - 1) // m) * m


def qnet_kernel(x_ref, w1_ref, b1_ref, w2_ref, b2_ref, o_ref):
    # fc1: MXU matmul (f32 operands, f32 accumulation) + bias + ReLU on the VPU.
    h = jnp.dot(x_ref[...], w1_ref[...], preferred_element_type=jnp.float32)
    h = jnp.maximum(h + b1_ref[...], 0.0)
    # fc2: second MXU matmul + bias.
    q = jnp.dot(h, w2_ref[...], preferred_element_type=jnp.float32)
    o_ref[...] = (q + b2_ref[...]).astype(o_ref.dtype)


def prepare_qnet_params(w1, b1, w2, b2):
    """One-time parameter prep (do this at init, NOT per forward call).

    Lane-pads hidden/action dims to multiples of 128 (zero padding is exact:
    padded hidden cols stay 0 through bias+ReLU and contribute 0 via the
    zero-padded w2 rows; padded output cols are sliced off after the call).

    w1: [state, hidden]  b1: [hidden] or [1, hidden]
    w2: [hidden, action] b2: [action] or [1, action]
    """
    state_dim, hidden_dim = w1.shape
    action_dim = w2.shape[1]
    HP = _round_up(hidden_dim, 128)
    AP = _round_up(action_dim, 128)
    f32 = jnp.float32
    w1p = jnp.zeros((state_dim, HP), f32).at[:, :hidden_dim].set(w1.astype(f32))
    b1p = jnp.zeros((1, HP), f32).at[:, :hidden_dim].set(
        b1.reshape(1, -1).astype(f32))
    w2p = jnp.zeros((HP, AP), f32).at[:hidden_dim, :action_dim].set(w2.astype(f32))
    b2p = jnp.zeros((1, AP), f32).at[:, :action_dim].set(
        b2.reshape(1, -1).astype(f32))
    return (w1p, b1p, w2p, b2p), (hidden_dim, action_dim)


@functools.partial(jax.jit, static_argnames=("hidden_dim", "action_dim", "num_tiles"))
def qnet_forward(x, w1p, b1p, w2p, b2p, *, hidden_dim, action_dim, num_tiles=1):
    """x: [B, state_dim] f32; padded params from prepare_qnet_params.
       Returns [B, action_dim] f32."""
    B, state_dim = x.shape
    HP = w1p.shape[1]
    AP = w2p.shape[1]

    # Exactly `num_tiles` grid steps: 1 on single-TC chips (v5e/v6e),
    # 2 on v7x so the parallel batch axis shards across both TensorCores.
    TB = _round_up(pl.cdiv(B, num_tiles), 8)
    BP = TB * num_tiles
    xp = x if BP == B else jnp.zeros((BP, state_dim), x.dtype).at[:B].set(x)

    # Advisory cost from the TRUE (unpadded) problem size.
    flops = 2 * B * (state_dim * hidden_dim + hidden_dim * action_dim)
    bytes_accessed = (
        B * state_dim * 4
        + state_dim * hidden_dim * 4 + hidden_dim * 4
        + hidden_dim * action_dim * 4 + action_dim * 4
        + B * action_dim * 4
    )

    out_padded = pl.pallas_call(
        qnet_kernel,
        out_shape=jax.ShapeDtypeStruct((BP, AP), jnp.float32),
        grid=(num_tiles,),
        in_specs=[
            pl.BlockSpec((TB, state_dim), lambda i: (i, 0)),  # x tile marches with grid
            pl.BlockSpec((state_dim, HP), lambda i: (0, 0)),  # weights stay VMEM-resident
            pl.BlockSpec((1, HP), lambda i: (0, 0)),
            pl.BlockSpec((HP, AP), lambda i: (0, 0)),
            pl.BlockSpec((1, AP), lambda i: (0, 0)),
        ],
        out_specs=pl.BlockSpec((TB, AP), lambda i: (i, 0)),
        compiler_params=pltpu.CompilerParams(
            dimension_semantics=("parallel",),  # one tile per TC on v7x
        ),
        cost_estimate=pl.CostEstimate(
            flops=flops, transcendentals=0, bytes_accessed=bytes_accessed),
    )(xp, w1p, b1p, w2p, b2p)

    return out_padded[:B, :action_dim]


def _num_tensorcores_per_chip() -> int:
    """2 grid tiles on v7x (2 TensorCores/chip), 1 on v5e/v6e."""
    try:
        kind = jax.devices()[0].device_kind.lower()
        if "v7" in kind:
            return 2
    except Exception:
        pass
    return 1


def init_qnet_params(key, state_dim, hidden_dim, action_dim):
    """Deterministic init mirroring torch.nn.Linear's U(-1/sqrt(fan_in), 1/sqrt(fan_in)).
    Weights stored already transposed to [in, out]."""
    k1, k2, k3, k4 = jax.random.split(key, 4)
    bound1 = 1.0 / jnp.sqrt(state_dim)
    bound2 = 1.0 / jnp.sqrt(hidden_dim)
    w1 = jax.random.uniform(k1, (state_dim, hidden_dim), jnp.float32, -bound1, bound1)
    b1 = jax.random.uniform(k2, (1, hidden_dim), jnp.float32, -bound1, bound1)
    w2 = jax.random.uniform(k3, (hidden_dim, action_dim), jnp.float32, -bound2, bound2)
    b2 = jax.random.uniform(k4, (1, action_dim), jnp.float32, -bound2, bound2)
    return w1, b1, w2, b2


if __name__ == "__main__":
    # DQN Q-network shapes (CartPole-like): state=4, hidden=32, actions=2,
    # small DQN-style minibatch.
    batch, state_dim, hidden_dim, action_dim = 64, 4, 32, 2

    key = jax.random.PRNGKey(0)
    kx, kp = jax.random.split(key)
    x = jax.random.normal(kx, (batch, state_dim), jnp.float32)
    w1, b1, w2, b2 = init_qnet_params(kp, state_dim, hidden_dim, action_dim)

    # One-time parameter prep (hoisted out of the per-step path).
    (w1p, b1p, w2p, b2p), (hd, ad) = prepare_qnet_params(w1, b1, w2, b2)

    num_tiles = _num_tensorcores_per_chip()
    out = qnet_forward(x, w1p, b1p, w2p, b2p,
                       hidden_dim=hd, action_dim=ad, num_tiles=num_tiles)
    out = jax.block_until_ready(out)

    # Reference in plain JAX (same math as the PyTorch forward, f32).
    ref = jnp.maximum(x @ w1 + b1, 0.0) @ w2 + b2
    assert out.shape == (batch, action_dim)
    # Pure f32 path -> tight tolerance.
    assert jnp.allclose(out, ref, atol=1e-5, rtol=1e-5), float(jnp.max(jnp.abs(out - ref)))

    print("KERNEL_OK")
</pallas_src>

<mosaic_0001>
module attributes {stable_mosaic.version = 11 : i64} {
  func.func @qnet_kernel(%arg0: i32, %arg1: memref<64x4xf32, #tpu.memory_space<vmem>>, %arg2: memref<4x128xf32, #tpu.memory_space<vmem>>, %arg3: memref<1x128xf32, #tpu.memory_space<vmem>>, %arg4: memref<128x128xf32, #tpu.memory_space<vmem>>, %arg5: memref<1x128xf32, #tpu.memory_space<vmem>>, %arg6: memref<64x128xf32, #tpu.memory_space<vmem>>) attributes {dimension_semantics = [#tpu.dimension_semantics<parallel>], iteration_bounds = array<i64: 1>, scalar_prefetch = 0 : i64, scratch_operands = 0 : i64, tpu.core_type = #tpu.core_type<tc>, window_params = [{transform_indices = @transform_0, window_bounds = array<i64: 64, 4>}, {pipeline_mode = #tpu.pipeline_mode<synchronous>, transform_indices = @transform_1, window_bounds = array<i64: 4, 128>}, {pipeline_mode = #tpu.pipeline_mode<synchronous>, transform_indices = @transform_2, window_bounds = array<i64: 1, 128>}, {pipeline_mode = #tpu.pipeline_mode<synchronous>, transform_indices = @transform_3, window_bounds = array<i64: 128, 128>}, {pipeline_mode = #tpu.pipeline_mode<synchronous>, transform_indices = @transform_4, window_bounds = array<i64: 1, 128>}, {transform_indices = @transform_5, window_bounds = array<i64: 64, 128>}]} {
    %c0 = arith.constant 0 : index
    %c0_0 = arith.constant 0 : index
    %0 = vector.load %arg1[%c0, %c0_0] : memref<64x4xf32, #tpu.memory_space<vmem>>, vector<64x4xf32>
    %c0_1 = arith.constant 0 : index
    %c0_2 = arith.constant 0 : index
    %1 = vector.load %arg2[%c0_1, %c0_2] : memref<4x128xf32, #tpu.memory_space<vmem>>, vector<4x128xf32>
    %cst = arith.constant dense<0.000000e+00> : vector<64x128xf32>
    %2 = tpu.matmul %0, %1, %cst {dimension_numbers = #tpu.dot_dimension_numbers<[1], [0], [0], [1], [0, 0, 1, 1], [], []>} : vector<64x4xf32>, vector<4x128xf32>, vector<64x128xf32> -> vector<64x128xf32>
    %c0_3 = arith.constant 0 : index
    %c0_4 = arith.constant 0 : index
    %3 = vector.load %arg3[%c0_3, %c0_4] : memref<1x128xf32, #tpu.memory_space<vmem>>, vector<1x128xf32>
    %4 = vector.broadcast %3 : vector<1x128xf32> to vector<64x128xf32>
    %5 = arith.addf %2, %4 : vector<64x128xf32>
    %cst_5 = arith.constant 0.000000e+00 : f32
    %6 = vector.broadcast %cst_5 : f32 to vector<64x128xf32>
    %7 = arith.maximumf %5, %6 : vector<64x128xf32>
    %c0_6 = arith.constant 0 : index
    %c0_7 = arith.constant 0 : index
    %8 = vector.load %arg4[%c0_6, %c0_7] : memref<128x128xf32, #tpu.memory_space<vmem>>, vector<128x128xf32>
    %cst_8 = arith.constant dense<0.000000e+00> : vector<64x128xf32>
    %9 = tpu.matmul %7, %8, %cst_8 {dimension_numbers = #tpu.dot_dimension_numbers<[1], [0], [0], [1], [0, 0, 1, 1], [], []>} : vector<64x128xf32>, vector<128x128xf32>, vector<64x128xf32> -> vector<64x128xf32>
    %c0_9 = arith.constant 0 : index
    %c0_10 = arith.constant 0 : index
    %10 = vector.load %arg5[%c0_9, %c0_10] : memref<1x128xf32, #tpu.memory_space<vmem>>, vector<1x128xf32>
    %11 = vector.broadcast %10 : vector<1x128xf32> to vector<64x128xf32>
    %12 = arith.addf %9, %11 : vector<64x128xf32>
    %c0_11 = arith.constant 0 : index
    %c0_12 = arith.constant 0 : index
    %13 = vector.load %arg6[%c0_11, %c0_12] : memref<64x128xf32, #tpu.memory_space<vmem>>, vector<64x128xf32>
    tpu.vector_store %arg6[%c0_11, %c0_12], %12 {strides = array<i32>} : memref<64x128xf32, #tpu.memory_space<vmem>>, vector<64x128xf32>,
    return
  }
  func.func @transform_0(%arg0: i32) -> (i32, i32) {
    %c0_i32 = arith.constant 0 : i32
    %c0_i32_0 = arith.constant 0 : i32
    return %arg0, %c0_i32 : i32, i32
  }
  func.func @transform_1(%arg0: i32) -> (i32, i32) {
    %c0_i32 = arith.constant 0 : i32
    %c0_i32_0 = arith.constant 0 : i32
    %c0_i32_1 = arith.constant 0 : i32
    return %c0_i32, %c0_i32_0 : i32, i32
  }
  func.func @transform_2(%arg0: i32) -> (i32, i32) {
    %c0_i32 = arith.constant 0 : i32
    %c0_i32_0 = arith.constant 0 : i32
    %c0_i32_1 = arith.constant 0 : i32
    return %c0_i32, %c0_i32_0 : i32, i32
  }
  func.func @transform_3(%arg0: i32) -> (i32, i32) {
    %c0_i32 = arith.constant 0 : i32
    %c0_i32_0 = arith.constant 0 : i32
    %c0_i32_1 = arith.constant 0 : i32
    return %c0_i32, %c0_i32_0 : i32, i32
  }
  func.func @transform_4(%arg0: i32) -> (i32, i32) {
    %c0_i32 = arith.constant 0 : i32
    %c0_i32_0 = arith.constant 0 : i32
    %c0_i32_1 = arith.constant 0 : i32
    return %c0_i32, %c0_i32_0 : i32, i32
  }
  func.func @transform_5(%arg0: i32) -> (i32, i32) {
    %c0_i32 = arith.constant 0 : i32
    %c0_i32_0 = arith.constant 0 : i32
    return %arg0, %c0_i32 : i32, i32
  }
}

</mosaic_0001>

<bundles_post_ra>
// kernel: qnet_forward.1
= control target key start
LH: loop header
LB: loop body
LE: loop exit
PB: predicated region body
PF: predicated region fallthrough
CT: control target
= control target key end

     0   :  { %10 = vsyncpa [#allocation3], 0  ;;  %s273_s21 = smov [#allocation2]   ;;  %s274_s23 = smov 128   ;;  %s374_s0 = inlined_call_operand.vmem [shape: f32[64,4], index: 0, kind: input, shape index: {}]   ;;  %s375_s1 = inlined_call_operand.vmem [shape: f32[4,128], index: 1, kind: input, shape index: {}]   ;;  %s376_s2 = inlined_call_operand.vmem [shape: f32[1,128], index: 2, kind: input, shape index: {}]   ;;  %s377_s3 = inlined_call_operand.hbm [shape: f32[128,128], index: 3, kind: input, shape index: {}]   ;;  %s378_s4 = inlined_call_operand.vmem [shape: f32[1,128], index: 4, kind: input, shape index: {}]   ;;  %s379_s5 = inlined_call_operand.vmem [shape: f32[64,128], index: 5, kind: output, shape index: {}]  }
   0x1   :  { %s21_s20 = sshll.u32 %s377_s3, 4  ;;  %s23_s22 = sshll.u32 %s273_s21, 4  ;;  %s22_s20 = int_to_ptr.hbm [resolvable:$true] %s21_s20  ;;  %s24_s22 = int_to_ptr.vmem [resolvable:$true] %s23_s22 }
   0x2   :  { %s275_s24 = smov 8  }
   0x3   :  { %29 = dma.hbm_to_vmem [thread:$0]  %s22_s20, 2048, %s24_s22, [#allocation3], %s274_s23, %s274_s23, %s275_s24  }
   0x4   :  { %271 = dma.done.wait [#allocation3], 2048  }
   0x5   :  { %272 = vsyncadd [#allocation3], 4294965248  ;;  %vm74_vm0 = vcmask 1043456   ;;  %vm49_vm1 = vcmask 31744   ;;  %v44_v0 = vld [vmem:[%s375_s1] sm:$0xf] }
   0x6   :  { %v36_v1 = vld [vmem:[%s374_s0] sm:$0xff]  ;;  %201 = vmatpush.msk.msra.mxu0 %vm74_vm0, %v44_v0  ;;  %v37_v2 = vld [vmem:[%s374_s0 + $0x8] sm:$0xff]  ;;  %v38_v3 = vld [vmem:[%s374_s0 + $0x10] sm:$0xff] }
   0x7   :  { %202 = vmatmul.msk.f32.vlgmr.msra.gmra.mxu0 %vm49_vm1, %v36_v1  ;;  %v39_v4 = vld [vmem:[%s374_s0 + $0x18] sm:$0xff]  ;;  %v141_v6 = vld [vmem:[#allocation2 + $0x70] sm:$0xff]  ;;  %v140_v7 = vld [vmem:[#allocation2 + $0x68] sm:$0xff] }
   0x8   :  { %v142_v5 = vld [vmem:[#allocation2 + $0x78] sm:$0xff]  ;;  %v139_v8 = vld [vmem:[#allocation2 + $0x60] sm:$0xff]  ;;  %v137_v11 = vld [vmem:[#allocation2 + $0x50] sm:$0xff] }
   0x9   :  { %147 = vmatpush.msra.mxu1 %v142_v5  ;;  %210 = vmatpush.msra.mxu2 %v142_v5  ;;  %v40_v9 = vld [vmem:[%s374_s0 + $0x20] sm:$0xff]  ;;  %v138_v10 = vld [vmem:[#allocation2 + $0x58] sm:$0xff]  ;;  %v136_v12 = vld [vmem:[#allocation2 + $0x48] sm:$0xff] }
   0xa   :  { %211 = vmatpush.msra.mxu3 %v142_v5  ;;  %v135_v13 = vld [vmem:[#allocation2 + $0x40] sm:$0xff]  ;;  %v41_v14 = vld [vmem:[%s374_s0 + $0x28] sm:$0xff]  ;;  %v134_v15 = vld [vmem:[#allocation2 + $0x38] sm:$0xff] }
   0xb   :  { %148 = vmatpush.msra.mxu1 %v141_v6  ;;  %212 = vmatpush.msra.mxu2 %v141_v6  ;;  %v133_v16 = vld [vmem:[#allocation2 + $0x30] sm:$0xff]  ;;  %v132_v17 = vld [vmem:[#allocation2 + $0x28] sm:$0xff]  ;;  %v131_v18 = vld [vmem:[#allocation2 + $0x20] sm:$0xff] }
   0xc   :  { %213 = vmatpush.msra.mxu3 %v141_v6  ;;  %v42_v19 = vld [vmem:[%s374_s0 + $0x30] sm:$0xff]  ;;  %v130_v20 = vld [vmem:[#allocation2 + $0x18] sm:$0xff]  ;;  %v128_v23 = vld [vmem:[#allocation2 + $0x8] sm:$0xff] }
   0xd   :  { %149 = vmatpush.msra.mxu1 %v140_v7  ;;  %214 = vmatpush.msra.mxu2 %v140_v7  ;;  %v43_v21 = vld [vmem:[%s374_s0 + $0x38] sm:$0xff]  ;;  %v129_v22 = vld [vmem:[#allocation2 + $0x10] sm:$0xff]  ;;  %v127_v24 = vld [vmem:[#allocation2] sm:$0xff] }
   0xe   :  { %215 = vmatpush.msra.mxu3 %v140_v7  ;;  %v245_v25 = vld [vmem:[%s376_s2] ss:$0 sm:$0xff] }
   0xf   :  { %203 = vmatmul.msk.f32.gmra.mxu0 %vm49_vm1, %v37_v2  ;;  %150 = vmatpush.msra.mxu1 %v139_v8  ;;  %v246_v50 = vld [vmem:[%s378_s4] ss:$0 sm:$0xff] }
  0x10   :  { %216 = vmatpush.msra.mxu2 %v139_v8  ;;  %217 = vmatpush.msra.mxu3 %v139_v8 }
  0x11   :  { %151 = vmatpush.msra.mxu1 %v138_v10 }
  0x12   :  { %218 = vmatpush.msra.mxu2 %v138_v10  ;;  %219 = vmatpush.msra.mxu3 %v138_v10 }
  0x13   :  { %152 = vmatpush.msra.mxu1 %v137_v11 }
  0x14   :  { %220 = vmatpush.msra.mxu2 %v137_v11  ;;  %221 = vmatpush.msra.mxu3 %v137_v11 }
  0x15   :  { %153 = vmatpush.msra.mxu1 %v136_v12 }
  0x16   :  { %222 = vmatpush.msra.mxu2 %v136_v12  ;;  %223 = vmatpush.msra.mxu3 %v136_v12 }
  0x17   :  { %204 = vmatmul.msk.f32.gmra.mxu0 %vm49_vm1, %v38_v3  ;;  %154 = vmatpush.msra.mxu1 %v135_v13 }
  0x18   :  { %224 = vmatpush.msra.mxu2 %v135_v13  ;;  %225 = vmatpush.msra.mxu3 %v135_v13 }
  0x19   :  { %155 = vmatpush.msra.mxu1 %v134_v15 }
  0x1a   :  { %226 = vmatpush.msra.mxu2 %v134_v15  ;;  %227 = vmatpush.msra.mxu3 %v134_v15 }
  0x1b   :  { %156 = vmatpush.msra.mxu1 %v133_v16 }
  0x1c   :  { %228 = vmatpush.msra.mxu2 %v133_v16  ;;  %229 = vmatpush.msra.mxu3 %v133_v16 }
  0x1d   :  { %157 = vmatpush.msra.mxu1 %v132_v17 }
  0x1e   :  { %230 = vmatpush.msra.mxu2 %v132_v17  ;;  %231 = vmatpush.msra.mxu3 %v132_v17 }
  0x1f   :  { %205 = vmatmul.msk.f32.gmra.mxu0 %vm49_vm1, %v39_v4  ;;  %158 = vmatpush.msra.mxu1 %v131_v18 }
  0x20   :  { %232 = vmatpush.msra.mxu2 %v131_v18  ;;  %233 = vmatpush.msra.mxu3 %v131_v18 }
  0x21   :  { %159 = vmatpush.msra.mxu1 %v130_v20 }
  0x22   :  { %234 = vmatpush.msra.mxu2 %v130_v20  ;;  %235 = vmatpush.msra.mxu3 %v130_v20 }
  0x23   :  { %160 = vmatpush.msra.mxu1 %v129_v22 }
  0x24   :  { %236 = vmatpush.msra.mxu2 %v129_v22  ;;  %237 = vmatpush.msra.mxu3 %v129_v22 }
  0x25   :  { %161 = vmatpush.msra.mxu1 %v128_v23 }
  0x26   :  { %238 = vmatpush.msra.mxu2 %v128_v23  ;;  %239 = vmatpush.msra.mxu3 %v128_v23 }
  0x27   :  { %206 = vmatmul.msk.f32.gmra.mxu0 %vm49_vm1, %v40_v9  ;;  %162 = vmatpush.msra.mxu1 %v127_v24 }
  0x28   :  { %240 = vmatpush.msra.mxu2 %v127_v24  ;;  %241 = vmatpush.msra.mxu3 %v127_v24 }
  0x2f   :  { %207 = vmatmul.msk.f32.gmra.mxu0 %vm49_vm1, %v41_v14 }
  0x37   :  { %208 = vmatmul.msk.f32.gmra.mxu0 %vm49_vm1, %v42_v19 }
  0x3f   :  { %209 = vmatmul.msk.f32.gmra.mxu0 %vm49_vm1, %v43_v21 }
  0x84   :  { %v95_v26 = vpop.f32.mrf.mxu0 }
  0x85   :  { %v96_v27 = vadd.f32 %v245_v25, %v95_v26 }
  0x87   :  { %v119_v28 = vmax.f32 %v96_v27, 0.0 }
  0x89   :  { %163 = vmatmul.f32.vlgmr.msra.gmra.mxu1 %v119_v28 }
  0x8c   :  { %v98_v29 = vpop.f32.mrf.mxu0 }
  0x8d   :  { %v99_v30 = vadd.f32 %v245_v25, %v98_v29 }
  0x8f   :  { %v120_v31 = vmax.f32 %v99_v30, 0.0 }
  0x91   :  { %166 = vmatmul.f32.gmra.mxu1 %v120_v31 }
  0x94   :  { %v101_v32 = vpop.f32.mrf.mxu0 }
  0x95   :  { %v102_v33 = vadd.f32 %v245_v25, %v101_v32 }
  0x97   :  { %v121_v34 = vmax.f32 %v102_v33, 0.0 }
  0x99   :  { %169 = vmatmul.f32.vlgmr.msra.gmra.mxu2 %v121_v34 }
  0x9c   :  { %v104_v35 = vpop.f32.mrf.mxu0 }
  0x9d   :  { %v105_v36 = vadd.f32 %v245_v25, %v104_v35 }
  0x9f   :  { %v122_v37 = vmax.f32 %v105_v36, 0.0 }
  0xa1   :  { %172 = vmatmul.f32.gmra.mxu2 %v122_v37 }
  0xa4   :  { %v107_v38 = vpop.f32.mrf.mxu0 }
  0xa5   :  { %v108_v39 = vadd.f32 %v245_v25, %v107_v38 }
  0xa7   :  { %v123_v40 = vmax.f32 %v108_v39, 0.0 }
  0xa9   :  { %175 = vmatmul.f32.gmra.mxu2 %v123_v40 }
  0xac   :  { %v110_v41 = vpop.f32.mrf.mxu0 }
  0xad   :  { %v111_v42 = vadd.f32 %v245_v25, %v110_v41 }
  0xaf   :  { %v124_v43 = vmax.f32 %v111_v42, 0.0 }
  0xb1   :  { %178 = vmatmul.f32.vlgmr.msra.gmra.mxu3 %v124_v43 }
  0xb4   :  { %v113_v44 = vpop.f32.mrf.mxu0 }
  0xb5   :  { %v114_v45 = vadd.f32 %v245_v25, %v113_v44 }
  0xb7   :  { %v125_v46 = vmax.f32 %v114_v45, 0.0 }
  0xb9   :  { %181 = vmatmul.f32.gmra.mxu3 %v125_v46 }
  0xbc   :  { %v116_v47 = vpop.f32.mrf.mxu0 }
  0xbd   :  { %v117_v48 = vadd.f32 %v245_v25, %v116_v47 }
  0xbf   :  { %v126_v49 = vmax.f32 %v117_v48, 0.0 }
  0xc1   :  { %184 = vmatmul.f32.gmra.mxu3 %v126_v49 }
 0x106   :  { %v164_v51 = vpop.f32.mrf.mxu1 }
 0x107   :  { %v165_v52 = vadd.f32 %v246_v50, %v164_v51 }
 0x109   :  { %188 = vst [vmem:[%s379_s5] sm:$0xff] %v165_v52 }
 0x10e   :  { %v167_v53 = vpop.f32.mrf.mxu1 }
 0x10f   :  { %v168_v54 = vadd.f32 %v246_v50, %v167_v53 }
 0x111   :  { %189 = vst [vmem:[%s379_s5 + $0x8] sm:$0xff] %v168_v54 }
 0x11c   :  { %v170_v55 = vpop.f32.mrf.mxu2 }
 0x11d   :  { %v171_v56 = vadd.f32 %v246_v50, %v170_v55 }
 0x11f   :  { %190 = vst [vmem:[%s379_s5 + $0x10] sm:$0xff] %v171_v56 }
 0x124   :  { %v173_v57 = vpop.f32.mrf.mxu2 }
 0x125   :  { %v174_v58 = vadd.f32 %v246_v50, %v173_v57 }
 0x127   :  { %191 = vst [vmem:[%s379_s5 + $0x18] sm:$0xff] %v174_v58 }
 0x12c   :  { %v176_v59 = vpop.f32.mrf.mxu2 }
 0x12d   :  { %v177_v60 = vadd.f32 %v246_v50, %v176_v59 }
 0x12f   :  { %192 = vst [vmem:[%s379_s5 + $0x20] sm:$0xff] %v177_v60 }
 0x134   :  { %v179_v61 = vpop.f32.mrf.mxu3 }
 0x135   :  { %v180_v62 = vadd.f32 %v246_v50, %v179_v61 }
 0x137   :  { %193 = vst [vmem:[%s379_s5 + $0x28] sm:$0xff] %v180_v62 }
 0x13c   :  { %v182_v63 = vpop.f32.mrf.mxu3 }
 0x13d   :  { %v183_v0 = vadd.f32 %v246_v50, %v182_v63 }
 0x13f   :  { %194 = vst [vmem:[%s379_s5 + $0x30] sm:$0xff] %v183_v0 }
 0x144   :  { %v185_v1 = vpop.f32.mrf.mxu3 }
 0x145   :  { %v186_v2 = vadd.f32 %v246_v50, %v185_v1 }
 0x147   :  { %195 = vst [vmem:[%s379_s5 + $0x38] sm:$0xff] %v186_v2 }
 0x148   :  { %200 = vsyncpa [#allocation3], 1 }

</bundles_post_ra>
